<compile_context>
chip_gen: v5e
topology: v5e:2x2
jax: 0.10.0
libtpu: 0.0.40
codegen_flags: <defaults>
</compile_context>

<pallas_src>
import jax
import jax.numpy as jnp
from jax.experimental import pallas as pl
from jax.experimental.pallas import tpu as pltpu


# --------------------------------------------------------------------------
# Kernel body
# --------------------------------------------------------------------------
def _time_embedding_kernel(x_ref, w1_ref, b1_ref, w2_ref, b2_ref, o_ref):
    # First linear: (tm, E) @ (E, H) with f32 accumulation on the MXU.
    x = x_ref[...].astype(w1_ref.dtype)
    h = jnp.dot(x, w1_ref[...], preferred_element_type=jnp.float32)
    h = h + b1_ref[...]                      # (1, H) broadcasts over batch rows
    # SiLU: h * sigmoid(h)   (EUP handles exp, VPU the mul)
    h = h * jax.nn.sigmoid(h)
    # Second linear over this grid step's output-column slab: (tm, H) @ (H, Hn)
    out = jnp.dot(h.astype(w2_ref.dtype), w2_ref[...],
                  preferred_element_type=jnp.float32)
    out = out + b2_ref[...]
    o_ref[...] = out.astype(o_ref.dtype)


# --------------------------------------------------------------------------
# Hardware queries (robust: get_tpu_info with graceful fallbacks)
# --------------------------------------------------------------------------
def _tpu_vmem_capacity_bytes():
    try:
        cap = int(getattr(pltpu.get_tpu_info(), "vmem_capacity_bytes", 0))
        if cap > 0:
            return cap
    except Exception:
        pass
    try:
        kind = jax.devices()[0].device_kind.lower()
        if "v5" in kind or "v6" in kind:
            return 128 << 20
    except Exception:
        pass
    return 64 << 20          # conservative (v7x-sized) default


def _tensorcores_per_chip():
    try:
        info = pltpu.get_tpu_info()
        for name in ("num_cores", "cores_per_chip", "num_tensorcores"):
            v = getattr(info, name, None)
            if v:
                return int(v)
    except Exception:
        pass
    try:
        kind = jax.devices()[0].device_kind.lower()
        return 2 if "v7" in kind else 1
    except Exception:
        return 1


# --------------------------------------------------------------------------
# Tiling heuristics
# --------------------------------------------------------------------------
def _choose_m_tile(B, vmem_cap_bytes):
    # Large batches: 512-row tiles when VMEM is plentiful (v5e/v6e, 128 MiB),
    # 256 on 64-MiB chips (v7x).  Small batches: one block.
    big = 512 if vmem_cap_bytes >= (96 << 20) else 256
    return B if B <= big else big


def _default_n_split(B, H):
    # Only split output columns across TensorCores when compute actually
    # matters (large B) and the slab stays a multiple of 256 lanes (MXU-N).
    ncores = _tensorcores_per_chip()
    if ncores > 1 and B >= 1024 and H % (ncores * 256) == 0:
        return ncores
    return 1


# --------------------------------------------------------------------------
# Parameter preparation (call ONCE at load time, not per forward call)
# --------------------------------------------------------------------------
def prepare_time_embedding_params(w1, b1, w2, b2, param_dtype=jnp.bfloat16):
    """Cast weights to a compact dtype once; biases stay f32."""
    return (w1.astype(param_dtype), b1.astype(jnp.float32),
            w2.astype(param_dtype), b2.astype(jnp.float32))


# --------------------------------------------------------------------------
# Fused forward
# --------------------------------------------------------------------------
def time_embedding(x, w1, b1, w2, b2, *, n_split=None, m_tile=None):
    """Fused TimeEmbedding forward.

    x : (B, n_embed)
    w1: (n_embed, 4*n_embed)    -- transposed vs. PyTorch (out, in)
    b1: (4*n_embed,)
    w2: (4*n_embed, 4*n_embed)  -- transposed vs. PyTorch
    b2: (4*n_embed,)
    Weights are used in their stored dtype (pre-cast them once with
    prepare_time_embedding_params for the bf16 fast path).
    Returns (B, 4*n_embed) in x.dtype.
    """
    B, E = x.shape
    H = w1.shape[1]
    assert w1.shape == (E, H) and w2.shape == (H, H)
    assert b1.shape == (H,) and b2.shape == (H,)

    b1_row = b1.astype(jnp.float32).reshape(1, H)
    b2_row = b2.astype(jnp.float32).reshape(1, H)

    vmem_cap = _tpu_vmem_capacity_bytes()

    if n_split is None:
        n_split = _default_n_split(B, H)
    assert H % n_split == 0 and (H // n_split) % 128 == 0
    Hn = H // n_split

    if m_tile is None:
        m_tile = _choose_m_tile(B, vmem_cap)
    m_tile = min(m_tile, B)
    m_tiles = pl.cdiv(B, m_tile)   # ragged tail handled by Pallas masked writes

    w1_item = jnp.dtype(w1.dtype).itemsize
    w2_item = jnp.dtype(w2.dtype).itemsize
    x_item = jnp.dtype(x.dtype).itemsize
    out_item = x_item

    # VMEM budget: 1x grid-resident weights/biases + 2x (double-buffered)
    # streamed x/out tiles + headroom.  Clamp chip-aware.
    resident = E * H * w1_item + H * Hn * w2_item + (H + Hn) * 4
    streaming = 2 * m_tile * E * x_item + 2 * m_tile * Hn * out_item
    budget = resident + streaming + (2 << 20)
    cap = (32 << 20) if vmem_cap <= (64 << 20) else (64 << 20)
    vmem_limit = int(min(max(budget, 16 << 20), cap))

    cost = pl.CostEstimate(
        flops=2 * B * E * H + 2 * B * H * H + 4 * B * H,
        transcendentals=B * H,  # sigmoid
        bytes_accessed=(B * E * x_item
                        + E * H * w1_item + H * 4
                        + H * H * w2_item + H * 4
                        + B * H * out_item),
    )

    # Grid: (output-column split, batch tiles); M axis fastest so that for a
    # fixed column slab the weights stay VMEM-resident while x/out stream.
    return pl.pallas_call(
        _time_embedding_kernel,
        out_shape=jax.ShapeDtypeStruct((B, H), x.dtype),
        grid=(n_split, m_tiles),
        in_specs=[
            pl.BlockSpec((m_tile, E), lambda j, i: (i, 0)),   # x tile
            pl.BlockSpec((E, H), lambda j, i: (0, 0)),        # w1 (resident)
            pl.BlockSpec((1, H), lambda j, i: (0, 0)),        # b1
            pl.BlockSpec((H, Hn), lambda j, i: (0, j)),       # w2 column slab
            pl.BlockSpec((1, Hn), lambda j, i: (0, j)),       # b2 slab
        ],
        out_specs=pl.BlockSpec((m_tile, Hn), lambda j, i: (i, j)),
        compiler_params=pltpu.CompilerParams(
            dimension_semantics=("parallel", "parallel"),
            vmem_limit_bytes=vmem_limit,
        ),
        cost_estimate=cost,
    )(x, w1, b1_row, w2, b2_row)


# --------------------------------------------------------------------------
# Pure-JAX reference (mirrors the kernel's activation cast to weight dtype)
# --------------------------------------------------------------------------
def _reference(x, w1, b1, w2, b2):
    f32 = jnp.float32
    h = x.astype(w1.dtype).astype(f32) @ w1.astype(f32) + b1.astype(f32)
    h = h * jax.nn.sigmoid(h)
    h = h.astype(w2.dtype).astype(f32)
    return h @ w2.astype(f32) + b2.astype(f32)


if __name__ == "__main__":
    # Small, forward-consistent shapes: batch=2, n_embed=32 -> hidden=128.
    B, E = 2, 32
    H = 4 * E

    key = jax.random.PRNGKey(0)
    kx, k1, kb1, k2, kb2 = jax.random.split(key, 5)

    x = jax.random.normal(kx, (B, E), dtype=jnp.float32)
    # Deterministic param init (PyTorch Linear-ish uniform scale).
    w1 = jax.random.uniform(k1, (E, H), jnp.float32, -1.0, 1.0) / jnp.sqrt(E)
    b1 = jax.random.uniform(kb1, (H,), jnp.float32, -1.0, 1.0) / jnp.sqrt(E)
    w2 = jax.random.uniform(k2, (H, H), jnp.float32, -1.0, 1.0) / jnp.sqrt(H)
    b2 = jax.random.uniform(kb2, (H,), jnp.float32, -1.0, 1.0) / jnp.sqrt(H)

    # ---- Path 1: f32 weights exactly as the PyTorch module stores them ----
    out_f32 = jax.block_until_ready(time_embedding(x, w1, b1, w2, b2))
    ref_f32 = _reference(x, w1, b1, w2, b2)
    assert out_f32.shape == (B, H)
    err_f32 = float(jnp.max(jnp.abs(out_f32 - ref_f32)))
    assert jnp.allclose(out_f32, ref_f32, atol=2e-2, rtol=2e-2), \
        f"f32 path max abs err = {err_f32}"

    # ---- Path 2: bf16 weights pre-cast ONCE at "load time" (fast path) ----
    w1b, b1b, w2b, b2b = prepare_time_embedding_params(w1, b1, w2, b2)
    out_bf16 = jax.block_until_ready(time_embedding(x, w1b, b1b, w2b, b2b))
    ref_bf16 = _reference(x, w1b, b1b, w2b, b2b)
    err_bf16 = float(jnp.max(jnp.abs(out_bf16 - ref_bf16)))
    assert jnp.allclose(out_bf16, ref_bf16, atol=2e-2, rtol=2e-2), \
        f"bf16 path max abs err = {err_bf16}"

    print("KERNEL_OK")
</pallas_src>

<mosaic_0001>
module attributes {stable_mosaic.version = 11 : i64} {
  func.func @_time_embedding_kernel(%arg0: i32, %arg1: i32, %arg2: memref<2x32xf32, #tpu.memory_space<vmem>>, %arg3: memref<32x128xf32, #tpu.memory_space<vmem>>, %arg4: memref<1x128xf32, #tpu.memory_space<vmem>>, %arg5: memref<128x128xf32, #tpu.memory_space<vmem>>, %arg6: memref<1x128xf32, #tpu.memory_space<vmem>>, %arg7: memref<2x128xf32, #tpu.memory_space<vmem>>) attributes {dimension_semantics = [#tpu.dimension_semantics<parallel>, #tpu.dimension_semantics<parallel>], iteration_bounds = array<i64: 1, 1>, scalar_prefetch = 0 : i64, scratch_operands = 0 : i64, tpu.core_type = #tpu.core_type<tc>, window_params = [{transform_indices = @transform_0, window_bounds = array<i64: 2, 32>}, {pipeline_mode = #tpu.pipeline_mode<synchronous>, transform_indices = @transform_1, window_bounds = array<i64: 32, 128>}, {pipeline_mode = #tpu.pipeline_mode<synchronous>, transform_indices = @transform_2, window_bounds = array<i64: 1, 128>}, {transform_indices = @transform_3, window_bounds = array<i64: 128, 128>}, {transform_indices = @transform_4, window_bounds = array<i64: 1, 128>}, {transform_indices = @transform_5, window_bounds = array<i64: 2, 128>}]} {
    %c0 = arith.constant 0 : index
    %c0_0 = arith.constant 0 : index
    %0 = vector.load %arg2[%c0, %c0_0] : memref<2x32xf32, #tpu.memory_space<vmem>>, vector<2x32xf32>
    %c0_1 = arith.constant 0 : index
    %c0_2 = arith.constant 0 : index
    %1 = vector.load %arg3[%c0_1, %c0_2] : memref<32x128xf32, #tpu.memory_space<vmem>>, vector<32x128xf32>
    %cst = arith.constant dense<0.000000e+00> : vector<2x128xf32>
    %2 = tpu.matmul %0, %1, %cst {dimension_numbers = #tpu.dot_dimension_numbers<[1], [0], [0], [1], [0, 0, 1, 1], [], []>} : vector<2x32xf32>, vector<32x128xf32>, vector<2x128xf32> -> vector<2x128xf32>
    %c0_3 = arith.constant 0 : index
    %c0_4 = arith.constant 0 : index
    %3 = vector.load %arg4[%c0_3, %c0_4] : memref<1x128xf32, #tpu.memory_space<vmem>>, vector<1x128xf32>
    %4 = vector.broadcast %3 : vector<1x128xf32> to vector<2x128xf32>
    %5 = arith.addf %2, %4 : vector<2x128xf32>
    %6 = arith.negf %5 : vector<2x128xf32>
    %7 = math.exp %6 : vector<2x128xf32>
    %cst_5 = arith.constant 1.000000e+00 : f32
    %8 = vector.broadcast %cst_5 : f32 to vector<2x128xf32>
    %9 = arith.addf %8, %7 : vector<2x128xf32>
    %10 = arith.divf %8, %9 : vector<2x128xf32>
    %11 = arith.mulf %5, %10 : vector<2x128xf32>
    %c0_6 = arith.constant 0 : index
    %c0_7 = arith.constant 0 : index
    %12 = vector.load %arg5[%c0_6, %c0_7] : memref<128x128xf32, #tpu.memory_space<vmem>>, vector<128x128xf32>
    %cst_8 = arith.constant dense<0.000000e+00> : vector<2x128xf32>
    %13 = tpu.matmul %11, %12, %cst_8 {dimension_numbers = #tpu.dot_dimension_numbers<[1], [0], [0], [1], [0, 0, 1, 1], [], []>} : vector<2x128xf32>, vector<128x128xf32>, vector<2x128xf32> -> vector<2x128xf32>
    %c0_9 = arith.constant 0 : index
    %c0_10 = arith.constant 0 : index
    %14 = vector.load %arg6[%c0_9, %c0_10] : memref<1x128xf32, #tpu.memory_space<vmem>>, vector<1x128xf32>
    %15 = vector.broadcast %14 : vector<1x128xf32> to vector<2x128xf32>
    %16 = arith.addf %13, %15 : vector<2x128xf32>
    %c0_11 = arith.constant 0 : index
    %c0_12 = arith.constant 0 : index
    %17 = vector.load %arg7[%c0_11, %c0_12] : memref<2x128xf32, #tpu.memory_space<vmem>>, vector<2x128xf32>
    tpu.vector_store %arg7[%c0_11, %c0_12], %16 {strides = array<i32>} : memref<2x128xf32, #tpu.memory_space<vmem>>, vector<2x128xf32>,
    return
  }
  func.func @transform_0(%arg0: i32, %arg1: i32) -> (i32, i32) {
    %c0_i32 = arith.constant 0 : i32
    %c0_i32_0 = arith.constant 0 : i32
    return %arg1, %c0_i32 : i32, i32
  }
  func.func @transform_1(%arg0: i32, %arg1: i32) -> (i32, i32) {
    %c0_i32 = arith.constant 0 : i32
    %c0_i32_0 = arith.constant 0 : i32
    %c0_i32_1 = arith.constant 0 : i32
    return %c0_i32, %c0_i32_0 : i32, i32
  }
  func.func @transform_2(%arg0: i32, %arg1: i32) -> (i32, i32) {
    %c0_i32 = arith.constant 0 : i32
    %c0_i32_0 = arith.constant 0 : i32
    %c0_i32_1 = arith.constant 0 : i32
    return %c0_i32, %c0_i32_0 : i32, i32
  }
  func.func @transform_3(%arg0: i32, %arg1: i32) -> (i32, i32) {
    %c0_i32 = arith.constant 0 : i32
    %c0_i32_0 = arith.constant 0 : i32
    return %c0_i32, %arg0 : i32, i32
  }
  func.func @transform_4(%arg0: i32, %arg1: i32) -> (i32, i32) {
    %c0_i32 = arith.constant 0 : i32
    %c0_i32_0 = arith.constant 0 : i32
    return %c0_i32, %arg0 : i32, i32
  }
  func.func @transform_5(%arg0: i32, %arg1: i32) -> (i32, i32) {
    %c0_i32 = arith.constant 0 : i32
    return %arg1, %arg0 : i32, i32
  }
}

</mosaic_0001>

<bundles_post_ra>
// kernel: tpu_custom_call.1
= control target key start
LH: loop header
LB: loop body
LE: loop exit
PB: predicated region body
PF: predicated region fallthrough
CT: control target
= control target key end

     0   :  { %10 = vsyncpa [#allocation3], 0  ;;  %s348_s0 = inlined_call_operand.hbm [shape: f32[2,32], index: 0, kind: input, shape index: {}]   ;;  %s349_s1 = inlined_call_operand.hbm [shape: f32[32,128], index: 1, kind: input, shape index: {}]   ;;  %s350_s2 = inlined_call_operand.vmem [shape: f32[1,128], index: 2, kind: input, shape index: {}]   ;;  %s351_s3 = inlined_call_operand.hbm [shape: f32[128,128], index: 3, kind: input, shape index: {}]   ;;  %s352_s4 = inlined_call_operand.vmem [shape: f32[1,128], index: 4, kind: input, shape index: {}]   ;;  %s353_s5 = inlined_call_operand.hbm [shape: f32[2,128], index: 5, kind: output, shape index: {}]  }
   0x1   :  { %11 = vsyncpa [#allocation6], 0  ;;  %s28_s20 = sshll.u32 %s349_s1, 4  ;;  %s29_s20 = int_to_ptr.hbm [resolvable:$true] %s28_s20 }
   0x2   :  { %12 = vsyncpa [#allocation4], 0  ;;  %s294_s21 = smov [#allocation5]   ;;  %s18_s25 = sshll.u32 %s348_s0, 4  ;;  %s19_s25 = int_to_ptr.hbm [resolvable:$true] %s18_s25 }
   0x3   :  { %s30_s22 = sshll.u32 %s294_s21, 4  ;;  %s295_s26 = smov 128   ;;  %s31_s22 = int_to_ptr.vmem [resolvable:$true] %s30_s22 }
   0x4   :  { %s296_s27 = smov 8   ;;  %s297_s28 = smov [#allocation2]  }
   0x5   :  { %36 = dma.hbm_to_vmem [thread:$0]  %s29_s20, 512, %s31_s22, [#allocation6], %s295_s26, %s295_s26, %s296_s27  }
   0x6   :  { %s20_s29 = sshll.u32 %s297_s28, 4  ;;  %s43_s7 = sshll.u32 %s351_s3, 4  ;;  %s21_s29 = int_to_ptr.vmem [resolvable:$true] %s20_s29  ;;  %s44_s7 = int_to_ptr.hbm [resolvable:$true] %s43_s7 }
   0x7   :  { %23 = dma.hbm_to_vmem [thread:$0]  %s19_s25, 32, %s21_s29, [#allocation3]  }
   0x8   :  { %s298_s1 = smov [#allocation7]  }
   0x9   :  { %s45_s8 = sshll.u32 %s298_s1, 4  ;;  %s46_s8 = int_to_ptr.vmem [resolvable:$true] %s45_s8 }
   0xa   :  { %51 = dma.hbm_to_vmem [thread:$0]  %s44_s7, 2048, %s46_s8, [#allocation6], %s295_s26, %s295_s26, %s296_s27  }
   0xb   :  { %288 = dma.done.wait [#allocation3], 32  }
   0xc   :  { %289 = vsyncadd [#allocation3], 4294967264 }
   0xd   :  { %290 = dma.done.wait [#allocation6], 2560  }
   0xe   :  { %291 = vsyncadd [#allocation6], 4294964736  ;;  %v70_v0 = vld [vmem:[#allocation5 + $0x18] sm:$0xff]  ;;  %v69_v1 = vld [vmem:[#allocation5 + $0x10] sm:$0xff]  ;;  %vm75_vm0 = vcmask 261120   ;;  %s299_s10 = smov [#allocation8]  }
   0xf   :  { %91 = vmatpush.msra.mxu0 %v70_v0  ;;  %v68_v2 = vld [vmem:[#allocation5 + $0x8] sm:$0xff]  ;;  %v67_v3 = vld [vmem:[#allocation5] sm:$0xff]  ;;  %v66_v4 = vld [vmem:[#allocation2] sm:$0x3]  ;;  %s165_s11 = sshll.u32 %s299_s10, 4  ;;  %s167_s14 = sshll.u32 %s353_s5, 4  ;;  %s166_s11 = int_to_ptr.vmem [resolvable:$true] %s165_s11  ;;  %s168_s14 = int_to_ptr.hbm [resolvable:$true] %s167_s14 }
  0x10   :  { %v134_v5 = vld [vmem:[#allocation7 + $0x78] sm:$0xff]  ;;  %v133_v6 = vld [vmem:[#allocation7 + $0x70] sm:$0xff]  ;;  %v132_v7 = vld [vmem:[#allocation7 + $0x68] sm:$0xff] }
  0x11   :  { %92 = vmatpush.msra.mxu0 %v69_v1  ;;  %139 = vmatpush.msra.mxu1 %v134_v5  ;;  %v131_v8 = vld [vmem:[#allocation7 + $0x60] sm:$0xff]  ;;  %v130_v9 = vld [vmem:[#allocation7 + $0x58] sm:$0xff]  ;;  %v129_v10 = vld [vmem:[#allocation7 + $0x50] sm:$0xff] }
  0x12   :  { %v128_v11 = vld [vmem:[#allocation7 + $0x48] sm:$0xff]  ;;  %v127_v12 = vld [vmem:[#allocation7 + $0x40] sm:$0xff]  ;;  %v126_v13 = vld [vmem:[#allocation7 + $0x38] sm:$0xff] }
  0x13   :  { %93 = vmatpush.msra.mxu0 %v68_v2  ;;  %140 = vmatpush.msra.mxu1 %v133_v6  ;;  %v125_v14 = vld [vmem:[#allocation7 + $0x30] sm:$0xff]  ;;  %v124_v15 = vld [vmem:[#allocation7 + $0x28] sm:$0xff]  ;;  %v123_v16 = vld [vmem:[#allocation7 + $0x20] sm:$0xff] }
  0x14   :  { %v122_v17 = vld [vmem:[#allocation7 + $0x18] sm:$0xff]  ;;  %v121_v18 = vld [vmem:[#allocation7 + $0x10] sm:$0xff]  ;;  %v120_v19 = vld [vmem:[#allocation7 + $0x8] sm:$0xff] }
  0x15   :  { %94 = vmatpush.msra.mxu0 %v67_v3  ;;  %141 = vmatpush.msra.mxu1 %v132_v7  ;;  %v186_v20 = vld [vmem:[%s350_s2] ss:$0 sm:$0xff]  ;;  %v119_v21 = vld [vmem:[#allocation7] sm:$0xff] }
  0x16   :  { %178 = vmatmul.msk.f32.vlgmr.msra.gmra.mxu0 %vm75_vm0, %v66_v4  ;;  %v187_v38 = vld [vmem:[%s352_s4] ss:$0 sm:$0xff] }
  0x17   :  { %142 = vmatpush.msra.mxu1 %v131_v8 }
  0x19   :  { %143 = vmatpush.msra.mxu1 %v130_v9 }
  0x1b   :  { %144 = vmatpush.msra.mxu1 %v129_v10 }
  0x1d   :  { %145 = vmatpush.msra.mxu1 %v128_v11 }
  0x1f   :  { %146 = vmatpush.msra.mxu1 %v127_v12 }
  0x21   :  { %147 = vmatpush.msra.mxu1 %v126_v13 }
  0x23   :  { %148 = vmatpush.msra.mxu1 %v125_v14 }
  0x25   :  { %149 = vmatpush.msra.mxu1 %v124_v15 }
  0x27   :  { %150 = vmatpush.msra.mxu1 %v123_v16 }
  0x29   :  { %151 = vmatpush.msra.mxu1 %v122_v17 }
  0x2b   :  { %152 = vmatpush.msra.mxu1 %v121_v18 }
  0x2d   :  { %153 = vmatpush.msra.mxu1 %v120_v19 }
  0x2f   :  { %154 = vmatpush.msra.mxu1 %v119_v21 }
  0x93   :  { %v96_v22 = vpop.f32.mrf.mxu0 }
  0x94   :  { %v97_v23 = vadd.f32 %v186_v20, %v96_v22 }
  0x96   :  { %v179_v24 = vmul.f32 -1.442695, %v97_v23 }
  0x98   :  { %188 = vpow2.f32 %v179_v24 }
  0x9e   :  { %v189_v25 = vpop.eup %188 }
  0x9f   :  { %v102_v26 = vadd.f32 1.0, %v189_v25 }
  0xa1   :  { %190 = vrcp.f32 %v102_v26  ;;  %v114_v30 = vand.u32 2147483648, %v102_v26  ;;  %v112_v32 = vand.u32 2147483647, %v102_v26  ;;  %vm108_vm2 = vweird.f32 %v102_v26 }
  0xa3   :  { %v115_v34 = vor.u32 1.1754944e-38, %v114_v30  ;;  %vm113_vm4 = vcmp.eq.f32.partialorder %v112_v32, 8.507059e+37 }
  0xa7   :  { %v191_v27 = vpop.eup %190 }
  0xa8   :  { %v104_v28 = vmul.f32 %v191_v27, %v102_v26  ;;  %vm109_vm1 = vweird.f32 %v191_v27 }
  0xa9   :  { %vm110_vm3 = vmor %vm108_vm2, %vm109_vm1 }
  0xaa   :  { %v105_v29 = vsub.f32 1.0, %v104_v28 }
  0xac   :  { %v106_v31 = vmul.f32 %v191_v27, %v105_v29 }
  0xae   :  { %v107_v33 = vadd.f32 %v191_v27, %v106_v31 }
  0xb0   :  { %v111_v35 = vsel %vm110_vm3, %v191_v27, %v107_v33 }
  0xb1   :  { %v116_v36 = vsel %vm113_vm4, %v115_v34, %v111_v35 }
  0xb2   :  { %v118_v37 = vmul.f32 %v116_v36, %v97_v23 }
  0xb4   :  { %155 = vmatmul.f32.vlgmr.msra.gmra.mxu1 %v118_v37 }
 0x131   :  { %v156_v39 = vpop.f32.mrf.mxu1 }
 0x132   :  { %v157_v40 = vadd.f32 %v187_v38, %v156_v39 }
 0x134   :  { %159 = vst [vmem:[#allocation8] sm:$0x3] %v157_v40 }
 0x135   :  { %170 = dma.vmem_to_hbm [thread:$0]  %s166_s11, 32, %s168_s14, [#allocation4]  }
 0x136   :  { %292 = dma.done.wait [#allocation4], 32  }
 0x137   :  { %293 = vsyncadd [#allocation4], 4294967264 }
 0x138   :  { %175 = vsyncpa [#allocation3], 1 }
 0x139   :  { %176 = vsyncpa [#allocation6], 1 }
 0x13a   :  { %177 = vsyncpa [#allocation4], 1 }

</bundles_post_ra>
